<compile_context>
chip_gen: v6e
topology: v6e:2x2x1
jax: 0.10.0
libtpu: 0.0.40
codegen_flags: <defaults>
</compile_context>

<pallas_src>
import functools

import jax
import jax.numpy as jnp
import numpy as np
from jax.experimental import pallas as pl
from jax.experimental.pallas import tpu as pltpu


# ---------------------------------------------------------------------------
# Activation (shared by the kernel and the pure-JAX reference)
# ---------------------------------------------------------------------------
def _activate(y, act, negative_slope):
    if act == "relu":
        return jnp.maximum(y, 0.0)
    if act == "relu6":
        return jnp.minimum(jnp.maximum(y, 0.0), 6.0)
    if act == "elu":
        return jnp.where(y > 0, y, jnp.exp(jnp.minimum(y, 0.0)) - 1.0)
    if act == "lrelu":
        return jnp.where(y > 0, y, negative_slope * y)
    if act == "sigmoid":
        return 1.0 / (1.0 + jnp.exp(-y))
    if act == "tanh":
        return jnp.tanh(y)
    return y  # act=None / unknown -> identity (matches the module)


# ---------------------------------------------------------------------------
# Fused conv + bias + norm + act kernel
#   one grid step = one image x (one row tile | one GroupNorm group)
# ---------------------------------------------------------------------------
def _conv_norm_act_kernel(x_ref, w_ref, b_ref, g_ref, beta_ref, o_ref, *,
                          K, dilation, Wp, W_out, L, n_row_tiles, lane_aligned,
                          per_tap, epilogue, groups_in_tile, valid_count,
                          act, negative_slope, eps):
    # x_ref   : (1, Cin, FL)        pre-padded image, spatially flattened (row stride Wp)
    # w_ref   : (K*K, Cb, Cin)      per-tap weights        (per_tap=True)
    #           (Cb, K*K*Cin)       tap-major flat weights (per_tap=False)
    # b_ref   : (Cb, 1)             pre-norm conv bias (only used by the GN epilogue)
    # g_ref   : (Cb, 1)             scale  (GN gamma / BN scale / unused)
    # beta_ref: (Cb, 1)             shift  (GN beta / BN shift+bias / bias / unused)
    # o_ref   : (1, Cb, L)          channel-major, lane-dense output tile
    Cb = o_ref.shape[1]

    if n_row_tiles > 1:
        off = pl.program_id(1) * L
        if lane_aligned:  # _choose_row_tile guarantees L % 128 == 0 when tiling rows
            off = pl.multiple_of(off, 128)
    else:
        off = 0  # static -> fully static (cheap) tap slices in the common case

    # Output position p = oy*Wp + ox under tap (ky, kx) reads the flat input at
    # off + (ky*d)*Wp + kx*d + p, so every tap is ONE contiguous 2-D slice.
    def tap(ky, kx):
        start = off + (ky * dilation) * Wp + kx * dilation
        return x_ref[0, :, pl.ds(start, L)]            # (Cin, L)

    if per_tap:
        # K*K accumulating MXU matmuls: never materializes the (K*K*Cin, L) patches.
        y = None
        t = 0
        for ky in range(K):
            for kx in range(K):
                part = jnp.dot(w_ref[t], tap(ky, kx),
                               preferred_element_type=jnp.float32)   # (Cb, L)
                y = part if y is None else y + part
                t += 1
    else:
        # tiny-Cin path: one concatenated matmul keeps the MXU contraction deep
        patches = jnp.concatenate(
            [tap(ky, kx) for ky in range(K) for kx in range(K)], axis=0)
        y = jnp.dot(w_ref[...], patches, preferred_element_type=jnp.float32)

    if epilogue == "gn":
        y = y + b_ref[...]
        # in-kernel validity mask ((lane % Wp) < W_out): keeps GN stats exact without
        # DMAing a mask array
        lane = jax.lax.broadcasted_iota(jnp.int32, (Cb, L), 1)
        y = jnp.where((lane % Wp) < W_out, y, 0.0)
        inv_cnt = 1.0 / float(valid_count)
        ch_sum = jnp.sum(y, axis=1, keepdims=True)      # (Cb, 1)
        ch_sq = jnp.sum(y * y, axis=1, keepdims=True)   # (Cb, 1)
        if groups_in_tile == 1:
            # group-split grid: this tile is exactly one GroupNorm group
            mu = jnp.sum(ch_sum, axis=0, keepdims=True) * inv_cnt
            ex2 = jnp.sum(ch_sq, axis=0, keepdims=True) * inv_cnt
            var = jnp.maximum(ex2 - mu * mu, 0.0)
            y = (y - mu) * jax.lax.rsqrt(var + eps)
        else:
            # fallback: all groups in one tile, static masked loop over groups
            Cg = Cb // groups_in_tile
            ch = jax.lax.broadcasted_iota(jnp.int32, (Cb, 1), 0)
            mean_c = jnp.zeros((Cb, 1), jnp.float32)
            inv_std_c = jnp.zeros((Cb, 1), jnp.float32)
            for g in range(groups_in_tile):  # static, tiny loop
                m = jnp.logical_and(ch >= g * Cg, ch < (g + 1) * Cg)
                mu = jnp.sum(jnp.where(m, ch_sum, 0.0), axis=0, keepdims=True) * inv_cnt
                ex2 = jnp.sum(jnp.where(m, ch_sq, 0.0), axis=0, keepdims=True) * inv_cnt
                var = jnp.maximum(ex2 - mu * mu, 0.0)
                mean_c = jnp.where(m, mu, mean_c)
                inv_std_c = jnp.where(m, jax.lax.rsqrt(var + eps), inv_std_c)
            y = (y - mean_c) * inv_std_c
        y = y * g_ref[...] + beta_ref[...]
    elif epilogue == "affine":   # eval-BatchNorm (+ bias) folded into one affine
        y = y * g_ref[...] + beta_ref[...]
    elif epilogue == "shift":    # norm=None, bias=True
        y = y + beta_ref[...]
    # epilogue == "none": nothing

    y = _activate(y, act, negative_slope)
    o_ref[0, :, :] = y.astype(o_ref.dtype)


# ---------------------------------------------------------------------------
# Tiling / VMEM helpers
# ---------------------------------------------------------------------------
def _choose_row_tile(H_out, Wp, row_bytes, budget):
    """Largest row tile whose per-step VMEM working set fits `budget`.

    When tiling is needed, only lane-aligned tiles ((TH*Wp) % 128 == 0) are used so
    tap-slice starts are provably 128-aligned and stores are unmasked.
    """
    max_th = max(1, min(H_out, budget // max(row_bytes, 1)))
    if max_th >= H_out:
        return H_out
    for th in range(max_th, 0, -1):
        if (th * Wp) % 128 == 0:
            return th
    # TODO(synk): support unaligned remainder row tiles (masked stores) instead of
    #             falling back to the whole image.
    return H_out


def _vmem_limit_bytes(need_bytes):
    """vmem_limit derived from the real per-step footprint, clamped per generation."""
    try:
        cap = int(pltpu.get_tpu_info().vmem_capacity_bytes) * 3 // 4
    except Exception:
        cap = 48 * 1024 * 1024  # v7x-safe fallback (64 MiB physical per TensorCore)
    want = int(need_bytes) * 3 // 2 + (2 << 20)
    return int(max(32 << 20, min(want, max(cap, 32 << 20))))


# ---------------------------------------------------------------------------
# ConvNormAct wrapper (NCHW in, NCHW out), mirroring the PyTorch module knobs
# ---------------------------------------------------------------------------
def conv_norm_act(x, params, *, kernel_size, stride=1, padding=0, dilation=1,
                  bias=True, norm=None, num_groups=8, act="relu",
                  negative_slope=0.1, reflect=False, eps=1e-5):
    if stride != 1:
        # TODO(synk): stride > 1 needs strided patch slicing; not implemented.
        raise NotImplementedError("stride != 1 is not supported by this Pallas kernel")

    N, Cin, H, W = x.shape
    K = int(kernel_size)
    d = int(dilation)
    p = int(padding)
    w = params["w"]                     # (Cout, Cin, K, K) -- PyTorch OIHW layout
    Cout = int(w.shape[0])

    # --- spatial padding (reflect or zero) -------------------------------------
    pad_mode = "reflect" if reflect else "constant"
    xp = jnp.pad(x, ((0, 0), (0, 0), (p, p), (p, p)), mode=pad_mode)
    Hp, Wp = H + 2 * p, W + 2 * p
    H_out = Hp - d * (K - 1)
    W_out = Wp - d * (K - 1)
    assert H_out > 0 and W_out > 0

    # --- compute-path selection --------------------------------------------------
    per_tap = Cin >= 32                                   # per-tap accumulating matmuls
    use_bf16 = (Cin % 16 == 0) and (Cout % 8 == 0)        # bf16 operands, f32 accumulate
    cdt = jnp.bfloat16 if use_bf16 else jnp.float32
    dbytes = 2 if use_bf16 else 4

    gn = (norm == "gn")
    if gn:
        assert Cout % num_groups == 0
        Cg = Cout // num_groups
        group_split = (Cg % 8 == 0) or (num_groups == 1)  # sublane-aligned group blocks
    else:
        Cg = Cout
        group_split = False

    # --- per-channel vectors (bias folded into the affine when possible) --------
    b_vec = (params["b"].astype(jnp.float32) if bias
             else jnp.zeros((Cout,), jnp.float32))
    if gn:
        b2 = b_vec.reshape(Cout, 1)
        g2 = params["gamma"].reshape(Cout, 1).astype(jnp.float32)
        be2 = params["beta"].reshape(Cout, 1).astype(jnp.float32)
        epilogue = "gn"
    elif norm == "bn":
        # Eval-mode BatchNorm folded (together with the conv bias) into y*scale+shift.
        # TODO(synk): training-mode BatchNorm (batch statistics) is not implemented.
        scale = params["gamma"].astype(jnp.float32) / jnp.sqrt(
            params["running_var"].astype(jnp.float32) + eps)
        shift = ((b_vec - params["running_mean"].astype(jnp.float32)) * scale
                 + params["beta"].astype(jnp.float32))
        b2 = jnp.zeros((Cout, 1), jnp.float32)
        g2 = scale.reshape(Cout, 1)
        be2 = shift.reshape(Cout, 1)
        epilogue = "affine"
    else:
        b2 = jnp.zeros((Cout, 1), jnp.float32)
        g2 = jnp.ones((Cout, 1), jnp.float32)
        be2 = b_vec.reshape(Cout, 1)
        epilogue = "shift" if bias else "none"

    # --- row tiling (GroupNorm needs whole-image stats per group) ---------------
    if gn:
        TH, R = H_out, 1
        # TODO(synk): two-pass GroupNorm for images whose whole-image tile exceeds VMEM.
    else:
        row_bytes = Wp * (3 * Cout * 4
                          + (2 * Cin if per_tap else K * K * Cin) * dbytes)
        TH = _choose_row_tile(H_out, Wp, row_bytes, budget=16 * 1024 * 1024)
        R = -(-H_out // TH)                               # remainder-tolerant grid
    L = TH * Wp
    lane_aligned = (L % 128 == 0)

    # --- flattened input, tail-padded so the last tile's largest tap is in-bounds
    extra = (R * TH - H_out) * Wp + (K - 1) * d
    xflat = jnp.pad(xp.reshape(N, Cin, Hp * Wp),
                    ((0, 0), (0, 0), (0, extra))).astype(cdt)
    FL = Hp * Wp + extra
    # TODO(synk): for large images (esp. v7x 64 MiB VMEM) replace this whole-image
    #             input block with a row-halo block / manual double-buffered DMA.

    # --- weights: (K*K, Cout, Cin) for per-tap (no in-kernel lane slicing); ------
    #     tap-major flat (Cout, K*K*Cin) for the concat path (matches patches order)
    if per_tap:
        w_in = jnp.transpose(w, (2, 3, 0, 1)).reshape(K * K, Cout, Cin).astype(cdt)
    else:
        w_in = jnp.transpose(w, (0, 2, 3, 1)).reshape(Cout, K * K * Cin).astype(cdt)

    # --- grid + BlockSpecs -------------------------------------------------------
    Cb = Cg if group_split else Cout
    if group_split:
        grid = (N, num_groups)
        sem = ("parallel", "parallel")     # one GN group per step: feeds both v7x TCs
        wmap3 = lambda n, j: (0, j, 0)
        wmap2 = lambda n, j: (j, 0)
        vmap = lambda n, j: (j, 0)
        omap = lambda n, j: (n, j, 0)
    else:
        grid = (N, R if not gn else 1)
        # the row axis reuses the image-wide input block -> keep it off the megacore
        # split so both TCs don't DMA the full image
        sem = ("parallel", "arbitrary")
        wmap3 = lambda n, j: (0, 0, 0)
        wmap2 = lambda n, j: (0, 0)
        vmap = lambda n, j: (0, 0)
        omap = lambda n, j: (n, 0, j)

    w_spec = (pl.BlockSpec((K * K, Cb, Cin), wmap3) if per_tap
              else pl.BlockSpec((Cb, K * K * Cin), wmap2))

    groups_in_tile = 1 if group_split else (num_groups if gn else 1)
    valid_count = Cg * H_out * W_out if gn else 1

    kernel = functools.partial(
        _conv_norm_act_kernel,
        K=K, dilation=d, Wp=Wp, W_out=W_out, L=L, n_row_tiles=R,
        lane_aligned=lane_aligned, per_tap=per_tap, epilogue=epilogue,
        groups_in_tile=groups_in_tile, valid_count=valid_count, act=act,
        negative_slope=float(negative_slope), eps=float(eps))

    # --- VMEM budget from the real per-step footprint ----------------------------
    in_bytes = Cin * FL * dbytes
    w_bytes = K * K * Cout * Cin * dbytes
    out_bytes = Cb * L * x.dtype.itemsize
    work_bytes = Cb * L * 4 + (0 if per_tap else K * K * Cin * L * dbytes)
    need = 2 * in_bytes + 2 * w_bytes + 2 * out_bytes + work_bytes
    vmem_limit = _vmem_limit_bytes(need)

    out_flat = pl.pallas_call(
        kernel,
        out_shape=jax.ShapeDtypeStruct((N, Cout, R * L), x.dtype),
        grid_spec=pltpu.PrefetchScalarGridSpec(
            num_scalar_prefetch=0,
            grid=grid,
            in_specs=[
                pl.BlockSpec((1, Cin, FL), lambda n, j: (n, 0, 0)),
                w_spec,
                pl.BlockSpec((Cb, 1), vmap),   # bias (pre-norm, GN only)
                pl.BlockSpec((Cb, 1), vmap),   # scale
                pl.BlockSpec((Cb, 1), vmap),   # shift
            ],
            out_specs=pl.BlockSpec((1, Cb, L), omap),
        ),
        compiler_params=pltpu.CompilerParams(
            dimension_semantics=sem,
            vmem_limit_bytes=vmem_limit,
        ),
    )(xflat, w_in, b2, g2, be2)

    # width-padded flat -> NCHW (junk lanes / remainder rows sliced off here)
    # TODO(synk): chained ConvNormAct layers could keep the Wp-padded layout and strip
    #             once at the end to avoid this extra HBM pass over the output.
    return out_flat.reshape(N, Cout, R * TH, Wp)[:, :, :H_out, :W_out]


# ---------------------------------------------------------------------------
# Parameter init + pure-JAX reference (same math) for the correctness check
# ---------------------------------------------------------------------------
def init_conv_norm_act_params(key, in_channels, out_channels, kernel_size,
                              bias=True, norm=None):
    kw, kb, kg, kbe = jax.random.split(key, 4)
    fan_in = in_channels * kernel_size * kernel_size
    s = 1.0 / np.sqrt(fan_in)
    params = {
        "w": jax.random.uniform(
            kw, (out_channels, in_channels, kernel_size, kernel_size),
            jnp.float32, -s, s),
    }
    if bias:
        params["b"] = jax.random.uniform(kb, (out_channels,), jnp.float32, -s, s)
    if norm in ("gn", "bn"):
        params["gamma"] = jax.random.uniform(kg, (out_channels,), jnp.float32, 0.5, 1.5)
        params["beta"] = 0.1 * jax.random.normal(kbe, (out_channels,), jnp.float32)
    if norm == "bn":
        params["running_mean"] = jnp.zeros((out_channels,), jnp.float32)
        params["running_var"] = jnp.ones((out_channels,), jnp.float32)
    return params


def conv_norm_act_reference(x, params, *, kernel_size, stride=1, padding=0,
                            dilation=1, bias=True, norm=None, num_groups=8,
                            act="relu", negative_slope=0.1, reflect=False, eps=1e-5):
    del kernel_size
    w = params["w"]
    p = int(padding)
    if reflect:
        xr = jnp.pad(x, ((0, 0), (0, 0), (p, p), (p, p)), mode="reflect")
        pad_spec = [(0, 0), (0, 0)]
    else:
        xr = x
        pad_spec = [(p, p), (p, p)]
    y = jax.lax.conv_general_dilated(
        xr, w, window_strides=(stride, stride), padding=pad_spec,
        rhs_dilation=(dilation, dilation),
        dimension_numbers=("NCHW", "OIHW", "NCHW"))
    if bias:
        y = y + params["b"][None, :, None, None]
    if norm == "gn":
        N_, C_, H_, W_ = y.shape
        G = num_groups
        yg = y.reshape(N_, G, C_ // G, H_, W_)
        mu = jnp.mean(yg, axis=(2, 3, 4), keepdims=True)
        var = jnp.mean(jnp.square(yg - mu), axis=(2, 3, 4), keepdims=True)
        yg = (yg - mu) / jnp.sqrt(var + eps)
        y = yg.reshape(N_, C_, H_, W_)
        y = y * params["gamma"][None, :, None, None] + params["beta"][None, :, None, None]
    elif norm == "bn":
        scale = params["gamma"] / jnp.sqrt(params["running_var"] + eps)
        shift = params["beta"] - params["running_mean"] * scale
        y = y * scale[None, :, None, None] + shift[None, :, None, None]
    return _activate(y, act, negative_slope)


if __name__ == "__main__":
    key = jax.random.PRNGKey(0)
    kx, kp1, kp2, kp3, kxc = jax.random.split(key, 5)
    x = jax.random.normal(kx, (2, 4, 16, 16), jnp.float32)  # NCHW

    # Config A: Conv3x3(pad=1) + bias + ReLU  (concat path, bias folded into shift)
    cfg_a = dict(kernel_size=3, stride=1, padding=1, dilation=1, bias=True,
                 norm=None, act="relu", reflect=False)
    params_a = init_conv_norm_act_params(kp1, 4, 8, 3, bias=True, norm=None)
    y_a = jax.block_until_ready(conv_norm_act(x, params_a, **cfg_a))
    r_a = conv_norm_act_reference(x, params_a, **cfg_a)
    np.testing.assert_allclose(np.asarray(y_a), np.asarray(r_a), rtol=2e-2, atol=2e-2)
    assert y_a.shape == (2, 8, 16, 16)

    # Config B: reflect-padded dilated Conv3x3 + bias + GroupNorm(2) + LeakyReLU
    #           (group-split grid: one GN group per step, in-kernel mask)
    cfg_b = dict(kernel_size=3, stride=1, padding=2, dilation=2, bias=True,
                 norm="gn", num_groups=2, act="lrelu", negative_slope=0.1,
                 reflect=True)
    params_b = init_conv_norm_act_params(kp2, 4, 16, 3, bias=True, norm="gn")
    y_b = jax.block_until_ready(conv_norm_act(x, params_b, **cfg_b))
    r_b = conv_norm_act_reference(x, params_b, **cfg_b)
    np.testing.assert_allclose(np.asarray(y_b), np.asarray(r_b), rtol=2e-2, atol=2e-2)
    assert y_b.shape == (2, 16, 16, 16)

    # Config C: wider Conv3x3 + bias + eval-BatchNorm + ELU
    #           (per-tap accumulating matmuls, bf16 operands, folded affine)
    x_c = jax.random.normal(kxc, (2, 32, 16, 16), jnp.float32)
    cfg_c = dict(kernel_size=3, stride=1, padding=1, dilation=1, bias=True,
                 norm="bn", act="elu", reflect=False)
    params_c = init_conv_norm_act_params(kp3, 32, 32, 3, bias=True, norm="bn")
    y_c = jax.block_until_ready(conv_norm_act(x_c, params_c, **cfg_c))
    r_c = conv_norm_act_reference(x_c, params_c, **cfg_c)
    np.testing.assert_allclose(np.asarray(y_c), np.asarray(r_c), rtol=4e-2, atol=4e-2)
    assert y_c.shape == (2, 32, 16, 16)

    print("KERNEL_OK")
</pallas_src>

<mosaic_0001>
module attributes {stable_mosaic.version = 11 : i64} {
  func.func @_conv_norm_act_kernel(%arg0: i32, %arg1: i32, %arg2: memref<1x4x326xf32, #tpu.memory_space<vmem>>, %arg3: memref<8x36xf32, #tpu.memory_space<vmem>>, %arg4: memref<8x1xf32, #tpu.memory_space<vmem>>, %arg5: memref<8x1xf32, #tpu.memory_space<vmem>>, %arg6: memref<8x1xf32, #tpu.memory_space<vmem>>, %arg7: memref<1x8x288xf32, #tpu.memory_space<vmem>>) attributes {dimension_semantics = [#tpu.dimension_semantics<parallel>, #tpu.dimension_semantics<arbitrary>], iteration_bounds = array<i64: 2, 1>, scalar_prefetch = 0 : i64, scratch_operands = 0 : i64, tpu.core_type = #tpu.core_type<tc>, window_params = [{transform_indices = @transform_0, window_bounds = array<i64: 1, 4, 326>}, {pipeline_mode = #tpu.pipeline_mode<synchronous>, transform_indices = @transform_1, window_bounds = array<i64: 8, 36>}, {pipeline_mode = #tpu.pipeline_mode<synchronous>, transform_indices = @transform_2, window_bounds = array<i64: 8, 1>}, {pipeline_mode = #tpu.pipeline_mode<synchronous>, transform_indices = @transform_3, window_bounds = array<i64: 8, 1>}, {pipeline_mode = #tpu.pipeline_mode<synchronous>, transform_indices = @transform_4, window_bounds = array<i64: 8, 1>}, {transform_indices = @transform_5, window_bounds = array<i64: 1, 8, 288>}]} {
    %c0 = arith.constant 0 : index
    %c0_0 = arith.constant 0 : index
    %c0_1 = arith.constant 0 : index
    %0 = vector.load %arg2[%c0, %c0_0, %c0_1] : memref<1x4x326xf32, #tpu.memory_space<vmem>>, vector<1x4x288xf32>
    %1 = vector.shape_cast %0 : vector<1x4x288xf32> to vector<4x288xf32>
    %c0_2 = arith.constant 0 : index
    %c0_3 = arith.constant 0 : index
    %c1 = arith.constant 1 : index
    %2 = vector.load %arg2[%c0_2, %c0_3, %c1] : memref<1x4x326xf32, #tpu.memory_space<vmem>>, vector<1x4x288xf32>
    %3 = vector.shape_cast %2 : vector<1x4x288xf32> to vector<4x288xf32>
    %c0_4 = arith.constant 0 : index
    %c0_5 = arith.constant 0 : index
    %c2 = arith.constant 2 : index
    %4 = vector.load %arg2[%c0_4, %c0_5, %c2] : memref<1x4x326xf32, #tpu.memory_space<vmem>>, vector<1x4x288xf32>
    %5 = vector.shape_cast %4 : vector<1x4x288xf32> to vector<4x288xf32>
    %c0_6 = arith.constant 0 : index
    %c0_7 = arith.constant 0 : index
    %c18 = arith.constant 18 : index
    %6 = vector.load %arg2[%c0_6, %c0_7, %c18] : memref<1x4x326xf32, #tpu.memory_space<vmem>>, vector<1x4x288xf32>
    %7 = vector.shape_cast %6 : vector<1x4x288xf32> to vector<4x288xf32>
    %c0_8 = arith.constant 0 : index
    %c0_9 = arith.constant 0 : index
    %c19 = arith.constant 19 : index
    %8 = vector.load %arg2[%c0_8, %c0_9, %c19] : memref<1x4x326xf32, #tpu.memory_space<vmem>>, vector<1x4x288xf32>
    %9 = vector.shape_cast %8 : vector<1x4x288xf32> to vector<4x288xf32>
    %c0_10 = arith.constant 0 : index
    %c0_11 = arith.constant 0 : index
    %c20 = arith.constant 20 : index
    %10 = vector.load %arg2[%c0_10, %c0_11, %c20] : memref<1x4x326xf32, #tpu.memory_space<vmem>>, vector<1x4x288xf32>
    %11 = vector.shape_cast %10 : vector<1x4x288xf32> to vector<4x288xf32>
    %c0_12 = arith.constant 0 : index
    %c0_13 = arith.constant 0 : index
    %c36 = arith.constant 36 : index
    %12 = vector.load %arg2[%c0_12, %c0_13, %c36] : memref<1x4x326xf32, #tpu.memory_space<vmem>>, vector<1x4x288xf32>
    %13 = vector.shape_cast %12 : vector<1x4x288xf32> to vector<4x288xf32>
    %c0_14 = arith.constant 0 : index
    %c0_15 = arith.constant 0 : index
    %c37 = arith.constant 37 : index
    %14 = vector.load %arg2[%c0_14, %c0_15, %c37] : memref<1x4x326xf32, #tpu.memory_space<vmem>>, vector<1x4x288xf32>
    %15 = vector.shape_cast %14 : vector<1x4x288xf32> to vector<4x288xf32>
    %c0_16 = arith.constant 0 : index
    %c0_17 = arith.constant 0 : index
    %c38 = arith.constant 38 : index
    %16 = vector.load %arg2[%c0_16, %c0_17, %c38] : memref<1x4x326xf32, #tpu.memory_space<vmem>>, vector<1x4x288xf32>
    %17 = vector.shape_cast %16 : vector<1x4x288xf32> to vector<4x288xf32>
    %18 = tpu.concatenate %1, %3, %5, %7, %9, %11, %13, %15, %17 in 0 : vector<4x288xf32>, vector<4x288xf32>, vector<4x288xf32>, vector<4x288xf32>, vector<4x288xf32>, vector<4x288xf32>, vector<4x288xf32>, vector<4x288xf32>, vector<4x288xf32> -> vector<36x288xf32>
    %c0_18 = arith.constant 0 : index
    %c0_19 = arith.constant 0 : index
    %19 = vector.load %arg3[%c0_18, %c0_19] : memref<8x36xf32, #tpu.memory_space<vmem>>, vector<8x36xf32>
    %cst = arith.constant dense<0.000000e+00> : vector<8x288xf32>
    %20 = tpu.matmul %19, %18, %cst {dimension_numbers = #tpu.dot_dimension_numbers<[1], [0], [0], [1], [0, 0, 1, 1], [], []>} : vector<8x36xf32>, vector<36x288xf32>, vector<8x288xf32> -> vector<8x288xf32>
    %c0_20 = arith.constant 0 : index
    %c0_21 = arith.constant 0 : index
    %21 = vector.load %arg6[%c0_20, %c0_21] : memref<8x1xf32, #tpu.memory_space<vmem>>, vector<8x1xf32>
    %22 = vector.broadcast %21 : vector<8x1xf32> to vector<8x288xf32>
    %23 = arith.addf %20, %22 : vector<8x288xf32>
    %cst_22 = arith.constant 0.000000e+00 : f32
    %24 = vector.broadcast %cst_22 : f32 to vector<8x288xf32>
    %25 = arith.maximumf %23, %24 : vector<8x288xf32>
    %c0_23 = arith.constant 0 : index
    %c0_24 = arith.constant 0 : index
    %c0_25 = arith.constant 0 : index
    %26 = vector.load %arg7[%c0_23, %c0_24, %c0_25] : memref<1x8x288xf32, #tpu.memory_space<vmem>>, vector<1x8x288xf32>
    %27 = vector.shape_cast %26 : vector<1x8x288xf32> to vector<8x288xf32>
    %28 = vector.shape_cast %25 : vector<8x288xf32> to vector<1x8x288xf32>
    tpu.vector_store %arg7[%c0_23, %c0_24, %c0_25], %28 {strides = array<i32>} : memref<1x8x288xf32, #tpu.memory_space<vmem>>, vector<1x8x288xf32>,
    return
  }
  func.func @transform_0(%arg0: i32, %arg1: i32) -> (i32, i32, i32) {
    %c0_i32 = arith.constant 0 : i32
    %c0_i32_0 = arith.constant 0 : i32
    %c0_i32_1 = arith.constant 0 : i32
    return %arg0, %c0_i32, %c0_i32_0 : i32, i32, i32
  }
  func.func @transform_1(%arg0: i32, %arg1: i32) -> (i32, i32) {
    %c0_i32 = arith.constant 0 : i32
    %c0_i32_0 = arith.constant 0 : i32
    %c0_i32_1 = arith.constant 0 : i32
    return %c0_i32, %c0_i32_0 : i32, i32
  }
  func.func @transform_2(%arg0: i32, %arg1: i32) -> (i32, i32) {
    %c0_i32 = arith.constant 0 : i32
    %c0_i32_0 = arith.constant 0 : i32
    %c0_i32_1 = arith.constant 0 : i32
    return %c0_i32, %c0_i32_0 : i32, i32
  }
  func.func @transform_3(%arg0: i32, %arg1: i32) -> (i32, i32) {
    %c0_i32 = arith.constant 0 : i32
    %c0_i32_0 = arith.constant 0 : i32
    %c0_i32_1 = arith.constant 0 : i32
    return %c0_i32, %c0_i32_0 : i32, i32
  }
  func.func @transform_4(%arg0: i32, %arg1: i32) -> (i32, i32) {
    %c0_i32 = arith.constant 0 : i32
    %c0_i32_0 = arith.constant 0 : i32
    %c0_i32_1 = arith.constant 0 : i32
    return %c0_i32, %c0_i32_0 : i32, i32
  }
  func.func @transform_5(%arg0: i32, %arg1: i32) -> (i32, i32, i32) {
    %c0_i32 = arith.constant 0 : i32
    %c0_i32_0 = arith.constant 0 : i32
    return %arg0, %c0_i32, %arg1 : i32, i32, i32
  }
}

</mosaic_0001>

<bundles_post_ra>
// kernel: tpu_custom_call.1
= control target key start
LH: loop header
LB: loop body
LE: loop exit
PB: predicated region body
PF: predicated region fallthrough
CT: control target
= control target key end

     0   :  { %10 = vsyncpa [#allocation3], 0  ;;  %s1077_s0 = inlined_call_operand.vmem [shape: f32[2,4,326], index: 0, kind: input, shape index: {}]   ;;  %s1078_s1 = inlined_call_operand.hbm [shape: f32[8,36], index: 1, kind: input, shape index: {}]   ;;  %s1079_s2 = inlined_call_operand.vmem [shape: f32[8,1], index: 2, kind: input, shape index: {}]   ;;  %s1080_s3 = inlined_call_operand.vmem [shape: f32[8,1], index: 3, kind: input, shape index: {}]   ;;  %s1081_s4 = inlined_call_operand.vmem [shape: f32[8,1], index: 4, kind: input, shape index: {}]   ;;  %s1082_s5 = inlined_call_operand.hbm [shape: f32[2,8,288], index: 5, kind: output, shape index: {}]  }
   0x1   :  { %11 = vsyncpa [#allocation4], 0 }
   0x2   :  { %13 = vsyncpa [#allocation4 + $0x1], 0  ;;  %s899_s18 = smov 0   ;;  %s901_s19 = smov 0  }
   0x3   :  { %s903_s20 = smov 0   ;;  %s905_s21 = smov 0  }
   0x4   :  { %s907_s2 = smov 0   ;;  %s909_s3 = smov 0  }
   0x5 LB: > { %s629_s22 = sadd.s32 4294967295, %s854_s3   ;;  %s630_s23 = sadd.s32 4294967294, %s854_s3   ;;  %s854_s3 = sphi %s909_s3, %s19_s3   ;;  %s850_s2 = sphi %s907_s2, %s1091_s2   ;;  %s846_s21 = sphi %s905_s21, %s1090_s21   ;;  %s842_s20 = sphi %s903_s20, %s1089_s20   ;;  %s838_s19 = sphi %s901_s19, %s1088_s19   ;;  %s834_s18 = sphi %s899_s18, %s1087_s18  }
   0x6   : > { %s31_s24 = sadd.s32 1, %s850_s2  ;;  %s150_s25 = sadd.s32 1, %s842_s20 }
   0x7   : > { %p33_p0 = scmp.ge.s32.totalorder %s31_s24, 2  ;;  %p160_p1 = scmp.ne.s32.totalorder %s842_s20, %s838_s19 }
   0x8   : > { %p161_p2 = scmp.eq.s32.totalorder %s629_s22, 1  ;;  %p166_p3 = scmp.ne.s32.totalorder %s838_s19, %s834_s18 }
   0x9   : > { %s1093_s24 = smov (%p33_p0, %s31_s24), 0  ;;  %p167_p5 = scmp.eq.s32.totalorder %s630_s23, 1 }
   0xa   : > { %p939_p4 = por %p161_p2, %p160_p1  ;;  %s145_s27 = ssub.s32 %s850_s2, %s1093_s24 }
   0xb   : > { %p631_p6 = scmp.ge.s32.totalorder %s854_s3, 1  ;;  %p148_p7 = scmp.eq.s32.totalorder %s145_s27, 0 }
   0xc   : > { %p946_p8 = por %p167_p5, %p166_p3  ;;  %p174_p9 = scmp.lt.s32.totalorder %s854_s3, 3 }
   0xd   : > { %s952_s29 = scalar_select %p148_p7, %s842_s20, %s150_s25  }
   0xe   : > { %p954_p10 = pnand %p631_p6, %p174_p9  ;;  %p958_p11 = scmp.eq.s32.totalorder %s629_s22, 0 }
   0xf   : > { %s856_s7 = smov [#allocation2]  }
  0x10   : > { %p673_p12 = pneg %p954_p10  ;;  %s187_s8 = sshll.u32 %s856_s7, 4  ;;  %s188_s8 = int_to_ptr.vmem [resolvable:$true] %s187_s8 }
  0x11   : > { %s759_s9 = scalar_lea.vmem %s188_s8, 128  ;;  %p767_p5 = scmp.lt.s32.totalorder %s188_s8, %s188_s8 }
  0x12   : > { %p674_p13 = pnand %p958_p11, %p673_p12  ;;  %p760_p1 = scmp.ne.s32.totalorder %s188_s8, %s759_s9 }
  0x13   : > { %p768_p6 = scmp.lt.s32.totalorder %s759_s9, %s759_s9 }
  0x14   : > { %p750_p0 = pneg %p674_p13 }
  0x15   : > { %p769_p7 = por %p768_p6, %p767_p5 }
  0x16   : > { %p762_p2 = pnand %p760_p1, %p750_p0 }
  0x18   : > { %p763_p3 = pneg %p762_p2 }
  0x1a   : > { %p770_p9 = pnand %p769_p7, %p763_p3 }
  0x1c   : > { %773 = shalt.err (!%p770_p9)
}
  0x1d   : > { %676 = dma.hbm_to_vmem [thread:$0]  (!%p674_p13), %s1078_s1, 128, %s188_s8, [#allocation3]  }
  0x1e   : > { %217 = sbr.rel (%p954_p10) target bundleno = 419 (0x1a3), region = 40 }
  0x23   : > { %825 = dma.done.wait (%p958_p11), [#allocation3], 128  }
  0x24   : > { %827 = vsyncadd (%p958_p11), [#allocation3], 4294967168  ;;  %p245_p12 = scmp.lt.s32.totalorder %s846_s21, 1  ;;  %v857_v0 = vmov 0.0   ;;  %s858_s17 = smov 92   ;;  %vm865_vm0 = vmmov 0  }
  0x25   : > { %651 = vmatprep.subr.mxu1 %v857_v0  ;;  %446 = vmatprep.mubr.f32.mxu0 %v857_v0  ;;  %s859_s22 = smov 90   ;;  %s860_s23 = smov 91   ;;  %v866_v6 = vmov 0   ;;  %v366_v7 = vld [vmem:[%s1081_s4] sm:$0xff]  ;;  %vm352_vm1 = vcmask 1043456   ;;  %vm349_vm2 = vcmask 736256  }
  0x26   : > { %s246_s12 = scalar_select %p245_p12, %s846_s21, 1  ;;  %661 = vmatprep.mubr.msk.f32.mxu1 %vm865_vm0, %v857_v0  ;;  %744 = vset.pattern.permute.xlu0 %v866_v6  ;;  %vm337_vm3 = vcmask 744448   ;;  %vm325_vm4 = vcmask 752640   ;;  %vm301_vm5 = vcmask 891904   ;;  %vm313_vm6 = vcmask 883712   ;;  %v365_v55 = vld [vmem:[#allocation2] sm:$0xff] }
  0x27   : > { %s861_s25 = smov 109   ;;  %s862_s27 = smov 108   ;;  %vm277_vm7 = vcmask 1031168   ;;  %vm289_vm8 = vcmask 900096   ;;  %vm265_vm9 = vcmask 1039360   ;;  %vm372_vm10 = vcmask 293888  }
  0x28   : > { %s665_s13 = smul.u32 12, %s246_s12  ;;  %s863_s30 = smov 126   ;;  %vm528_vm11 = vcmask 261120  }
  0x29   : > { %s864_s6 = smov 110   ;;  %s867_s7 = smov 127  }
  0x2a   : > { %s249_s16 = scalar_lea.vmem %s1077_s0, %s665_s13  ;;  %s242_s10 = sand.u32 1, %s838_s19  }
  0x2b   : > { %v982_v1 = vld [vmem:[%s249_s16 + $0x8] sm:$0xf]  ;;  %v984_v2 = vld [vmem:[%s249_s16] sm:$0xff]  ;;  %s664_s11 = smul.u32 24, %s242_s10 }
  0x2c   : > { %323 = vrot.lane.b32.xlu1 %v982_v1, %s858_s17  ;;  %347 = vrot.lane.b32.xlu0 %v982_v1, %s859_s22  ;;  %v990_v3 = vcombine.high %v984_v2, %v984_v2  ;;  %v258_v4 = vcombine.low %v982_v1, %v982_v1  ;;  %v257_v5 = vcombine.low %v984_v2, %v984_v2  ;;  %s666_s12 = smul.u32 384, %s846_s21  ;;  %s868_s21 = smov [#allocation5]  }
  0x2d   : > { %s244_s13 = scalar_lea.vmem [#allocation5], %s664_s11 }
  0x2e   : > { %s547_s14 = sshll.u32 %s244_s13, 4  ;;  %s548_s14 = int_to_ptr.vmem [resolvable:$true] %s547_s14 }
  0x30   : > { %333 = vrot.lane.b32.xlu0 %v984_v2, %s860_s23  ;;  %321 = vrot.lane.b32.xlu1 %v990_v3, %s858_s17 }
  0x34   : > { %335 = vrot.lane.b32.xlu1 %v258_v4, %s860_s23  ;;  %345 = vrot.lane.b32.xlu0 %v990_v3, %s859_s22 }
  0x38   : > { %319 = vrot.lane.b32.xlu1 %v984_v2, %s858_s17  ;;  %343 = vrot.lane.b32.xlu0 %v984_v2, %s859_s22  ;;  %s545_s17 = scalar_lea.hbm %s1082_s5, %s666_s12  ;;  %s531_s22 = scalar_lea.sflag [#allocation4], %s242_s10 }
  0x3c   : > { %297 = vrot.lane.b32.xlu1 %v990_v3, %s861_s25  ;;  %331 = vrot.lane.b32.xlu0 %v257_v5, %s860_s23  ;;  %s774_s23 = scalar_lea.vmem %s548_s14, 384 }
  0x3d   : > { %p775_p10 = scmp.ne.s32.totalorder %s548_s14, %s774_s23 }
  0x3f   : > { %p776_p11 = pnand %p775_p10, %p939_p4 }
  0x40   : > { %309 = vrot.lane.b32.xlu1 %v984_v2, %s862_s27  ;;  %299 = vrot.lane.b32.xlu0 %v982_v1, %s861_s25 }
  0x41   : > { %p777_p13 = pneg %p776_p11 }
  0x44   : > { %295 = vrot.lane.b32.xlu1 %v984_v2, %s861_s25  ;;  %311 = vrot.lane.b32.xlu0 %v258_v4, %s862_s27  ;;  %s778_s25 = sshll.u32 %s868_s21, 4  ;;  %s779_s25 = int_to_ptr.vmem [resolvable:$false] %s778_s25 }
  0x45   : > { %p781_p0 = scmp.lt.s32.totalorder %s548_s14, %s779_s25 }
  0x48   : > { %273 = vrot.lane.b32.xlu1 %v990_v3, %s863_s30  ;;  %307 = vrot.lane.b32.xlu0 %v257_v5, %s862_s27  ;;  %s780_s27 = scalar_lea.vmem %s779_s25, 768 }
  0x49   : > { %p782_p1 = scmp.lt.s32.totalorder %s780_s27, %s774_s23 }
  0x4b   : > { %p783_p2 = por %p782_p1, %p781_p0 }
  0x4c   : > { %285 = vrot.lane.b32.xlu1 %v984_v2, %s864_s6  ;;  %275 = vrot.lane.b32.xlu0 %v982_v1, %s863_s30 }
  0x4d   : > { %p784_p3 = pnand %p783_p2, %p777_p13 }
  0x50   : > { %271 = vrot.lane.b32.xlu1 %v984_v2, %s863_s30  ;;  %287 = vrot.lane.b32.xlu0 %v258_v4, %s864_s6 }
  0x54   : > { %261 = vrot.lane.b32.xlu1 %v984_v2, %s867_s7  ;;  %283 = vrot.lane.b32.xlu0 %v257_v5, %s864_s6 }
  0x58   : > { %259 = vrot.lane.b32.xlu1 %v257_v5, %s867_s7  ;;  %263 = vrot.lane.b32.xlu0 %v258_v4, %s867_s7 }
  0x5c   : > { %369 = vperm.xlu0 %744, %v366_v7  }
  0x9e   : > { %v324_v8 = vpop.permute.xlu1 %323  ;;  %v348_v9 = vpop.permute.xlu0 %347 }
  0x9f   : > { %652 = vmatpush3.msk.msra.mxu1 %vm352_vm1, %v348_v9 }
  0xa0   : > { %653 = vmatprep.subr.mxu1 %v857_v0 }
  0xa2   : > { %v334_v10 = vpop.permute.xlu0 %333  ;;  %v322_v11 = vpop.permute.xlu1 %321 }
  0xa3   : > { %v327_v19 = vsel %vm325_vm4, %v322_v11, %v324_v8 }
  0xa6   : > { %v336_v12 = vpop.permute.xlu1 %335  ;;  %v346_v13 = vpop.permute.xlu0 %345 }
  0xa7   : > { %v351_v14 = vsel %vm349_vm2, %v346_v13, %v348_v9  ;;  %v364_v15 = vsel %vm352_vm1, %v324_v8, %v336_v12  ;;  %v339_v16 = vsel %vm337_vm3, %v334_v10, %v336_v12 }
  0xa8   : > { %637 = vmatprep.subr.msk.mxu0 %vm352_vm1, %v351_v14  ;;  %654 = vmatpush3.msra.mxu1 %v364_v15  ;;  %v363_v21 = vsel %vm352_vm1, %v327_v19, %v339_v16 }
  0xa9   : > { %655 = vmatprep.subr.mxu1 %v857_v0 }
  0xaa   : > { %v320_v17 = vpop.permute.xlu1 %319  ;;  %v344_v18 = vpop.permute.xlu0 %343 }
  0xab   : > { %v350_v20 = vsel %vm349_vm2, %v344_v18, %v346_v13  ;;  %v326_v24 = vsel %vm325_vm4, %v320_v17, %v322_v11 }
  0xac   : > { %638 = vmatpush1.msk.msra.mxu0 %vm352_vm1, %v350_v20 }
  0xad   : > { %406 = vmatprep.subr.mxu0 %v363_v21 }
  0xae   : > { %v298_v22 = vpop.permute.xlu1 %297  ;;  %v332_v23 = vpop.permute.xlu0 %331 }
  0xaf   : > { %v338_v25 = vsel %vm337_vm3, %v332_v23, %v334_v10 }
  0xb0   : > { %v362_v26 = vsel %vm352_vm1, %v326_v24, %v338_v25 }
  0xb1   : > { %407 = vmatpush1.msra.mxu0 %v362_v26 }
  0xb2   : > { %v310_v27 = vpop.permute.xlu1 %309  ;;  %v300_v28 = vpop.permute.xlu0 %299 }
  0xb3   : > { %v303_v31 = vsel %vm301_vm5, %v298_v22, %v300_v28 }
  0xb6   : > { %v296_v29 = vpop.permute.xlu1 %295  ;;  %v312_v30 = vpop.permute.xlu0 %311 }
  0xb7   : > { %v315_v32 = vsel %vm313_vm6, %v310_v27, %v312_v30  ;;  %v361_v33 = vsel %vm352_vm1, %v300_v28, %v312_v30  ;;  %v302_v37 = vsel %vm301_vm5, %v296_v29, %v298_v22 }
  0xb8   : > { %656 = vmatpush3.msra.mxu1 %v361_v33  ;;  %v360_v34 = vsel %vm352_vm1, %v303_v31, %v315_v32 }
  0xb9   : > { %408 = vmatprep.subr.mxu0 %v360_v34  ;;  %657 = vmatprep.subr.mxu1 %v857_v0 }
  0xba   : > { %v274_v35 = vpop.permute.xlu1 %273  ;;  %v308_v36 = vpop.permute.xlu0 %307 }
  0xbb   : > { %v314_v38 = vsel %vm313_vm6, %v308_v36, %v310_v27 }
  0xbc   : > { %v359_v39 = vsel %vm352_vm1, %v302_v37, %v314_v38 }
  0xbd   : > { %409 = vmatpush1.msra.mxu0 %v359_v39 }
  0xbe   : > { %v286_v40 = vpop.permute.xlu1 %285  ;;  %v276_v41 = vpop.permute.xlu0 %275 }
  0xbf   : > { %v279_v44 = vsel %vm277_vm7, %v274_v35, %v276_v41 }
  0xc2   : > { %v272_v42 = vpop.permute.xlu1 %271  ;;  %v288_v43 = vpop.permute.xlu0 %287 }
  0xc3   : > { %v291_v45 = vsel %vm289_vm8, %v286_v40, %v288_v43  ;;  %v358_v46 = vsel %vm352_vm1, %v276_v41, %v288_v43  ;;  %v278_v50 = vsel %vm277_vm7, %v272_v42, %v274_v35 }
  0xc4   : > { %658 = vmatpush3.msra.mxu1 %v358_v46  ;;  %v357_v47 = vsel %vm352_vm1, %v279_v44, %v291_v45 }
  0xc5   : > { %410 = vmatprep.subr.mxu0 %v357_v47  ;;  %659 = vmatprep.subr.mxu1 %v857_v0 }
  0xc6   : > { %v262_v48 = vpop.permute.xlu1 %261  ;;  %v284_v49 = vpop.permute.xlu0 %283 }
  0xc7   : > { %v290_v51 = vsel %vm289_vm8, %v284_v49, %v286_v40 }
  0xc8   : > { %v356_v52 = vsel %vm352_vm1, %v278_v50, %v290_v51 }
  0xc9   : > { %411 = vmatpush1.msra.mxu0 %v356_v52 }
  0xca   : > { %v260_v53 = vpop.permute.xlu1 %259  ;;  %v264_v54 = vpop.permute.xlu0 %263 }
  0xcb   : > { %v266_v56 = vsel %vm265_vm9, %v260_v53, %v262_v48  ;;  %v267_v57 = vsel %vm265_vm9, %v262_v48, %v264_v54  ;;  %v355_v58 = vsel %vm352_vm1, %v982_v1, %v264_v54 }
  0xcc   : > { %660 = vmatpush3.msra.mxu1 %v355_v58  ;;  %v354_v59 = vsel %vm352_vm1, %v990_v3, %v267_v57  ;;  %v353_v60 = vsel %vm352_vm1, %v984_v2, %v266_v56 }
  0xcd   : > { %412 = vmatprep.subr.mxu0 %v354_v59  ;;  %662 = vmatmul.mubr.msk.f32.vlgmr.msra.gmra.mxu1 %vm372_vm10, %v365_v55 }
  0xce   : > { %413 = vmatpush1.msra.mxu0 %v353_v60 }
  0xcf   : > { %639 = vmatmul.mubr.msk.f32.vlgmr.msra.gmra.mxu0 %vm372_vm10, %v365_v55 }
  0xd7   : > { %v370_v62 = vpop.permute.xlu0 %369 }
 0x18d   : > { %v519_v61 = vpop.f32.mrf.mxu1 }
 0x18e   : > { %v520_v63 = vadd.f32 %v519_v61, %v370_v62 }
 0x18f   : > { %v448_v0 = vpop.f32.mrf.mxu0  ;;  %v663_v1 = vpop.f32.mrf.mxu1 }
 0x190   : > { %v449_v4 = vadd.f32 %v448_v0, %v370_v62  ;;  %v525_v5 = vmax.f32 %v520_v63, 0.0 }
 0x191   : > { %v450_v3 = vpop.f32.mrf.mxu0 }
 0x192   : > { %v523_v2 = vmax.f32 %v449_v4, 0.0  ;;  %529 = vst.msk [vmem:[%s244_s13 + $0x10] sm:$0xff] %vm528_vm11, %v525_v5  ;;  %v451_v6 = vadd.f32 %v450_v3, %v370_v62 }
 0x194   : > { %526 = vst [vmem:[%s244_s13] sm:$0xff] %v523_v2  ;;  %v524_v7 = vmax.f32 %v451_v6, 0.0 }
 0x196   : > { %527 = vst [vmem:[%s244_s13 + $0x8] sm:$0xff] %v524_v7 }
 0x197   : > { %787 = shalt.err (!%p784_p3)
}
 0x198   : > { %s788_s30 = scalar_lea.hbm %s545_s17, 384  ;;  %s792_s8 = scalar_lea.hbm %s1082_s5, 768 }
 0x199   : > { %p789_p5 = scmp.ne.s32.totalorder %s545_s17, %s788_s30  ;;  %p793_p9 = scmp.lt.s32.totalorder %s545_s17, %s1082_s5 }
 0x19a   : > { %p794_p12 = scmp.lt.s32.totalorder %s792_s8, %s788_s30 }
 0x19b   : > { %p790_p6 = pnand %p789_p5, %p939_p4 }
 0x19c   : > { %p795_p10 = por %p794_p12, %p793_p9 }
 0x19d   : > { %p791_p7 = pneg %p790_p6 }
 0x19f   : > { %p796_p11 = pnand %p795_p10, %p791_p7 }
 0x1a1   : > { %799 = shalt.err (!%p796_p11)
}
 0x1a2   : > { %671 = dma.vmem_to_hbm [thread:$0]  (%p939_p4), %s548_s14, 384, %s545_s17, %s531_s22  }
 0x1a3 PF: > { %p683_p13 = scmp.ge.s32.totalorder %s854_s3, 2  ;;  %s559_s11 = sand.u32 1, %s834_s18  }
 0x1a4   : > { %s560_s12 = scalar_lea.sflag [#allocation4], %s559_s11 }
 0x1a5   : > { %p678_p0 = pnand %p683_p13, %p946_p8 }
 0x1a7   : > { %p679_p1 = pneg %p678_p0 }
 0x1a9   : > { %829 = dma.done.wait (%p679_p1), %s560_s12, 384  }
 0x1aa   : > { %831 = vsyncadd (%p679_p1), %s560_s12, 4294966912  ;;  %s19_s3 = sadd.s32 1, %s854_s3   ;;  %s1087_s18 = smov %s838_s19 }
 0x1ab   : > { %p16_p2 = scmp.ge.s32.totalorder %s19_s3, 4   ;;  %s1088_s19 = smov %s842_s20 }
 0x1ac   : > { %s1089_s20 = smov %s952_s29  ;;  %s1090_s21 = smov %s850_s2 }
 0x1ad   : > { %s1091_s2 = smov %s1093_s24  ;;  %18 = sbr.rel (!%p16_p2) target bundleno = 5 (0x5), region = 80 }
 0x1b2   :  { %565 = vsyncpa [#allocation3], 1 }
 0x1b3   :  { %567 = vsyncpa [#allocation3 + $0x1], 1 }
 0x1b4   :  { %568 = vsyncpa [#allocation4], 1 }
 0x1b5   :  { %570 = vsyncpa [#allocation4 + $0x1], 1 }

</bundles_post_ra>
